<compile_context>
chip_gen: v5e
topology: v5e:2x2
jax: 0.10.0
libtpu: 0.0.40
codegen_flags: <defaults>
</compile_context>

<pallas_src>
import jax
import jax.numpy as jnp
from jax.experimental import pallas as pl
from jax.experimental.pallas import tpu as pltpu

_MiB = 1024 * 1024


# ----------------------------------------------------------------------------
# Kernel: whole fused 3-layer MLP, one batch tile per grid step.
# ----------------------------------------------------------------------------
def discriminator_kernel(x_ref, w1_ref, b1_ref, w2_ref, b2_ref, w3_ref, b3_ref,
                         out_ref):
    x = x_ref[...]                        # (tb, D), compute dtype
    w_dtype = w1_ref.dtype

    # Layer 1: MXU matmul in the weight dtype, f32 accumulation.
    h1 = jnp.dot(x, w1_ref[...], preferred_element_type=jnp.float32)
    h1 = h1 + b1_ref[...].astype(jnp.float32)
    h1 = jnp.where(h1 > 0, h1, 0.2 * h1)             # LeakyReLU(0.2), f32 VPU

    # Layer 2.
    h2 = jnp.dot(h1.astype(w_dtype), w2_ref[...],
                 preferred_element_type=jnp.float32)
    h2 = h2 + b2_ref[...].astype(jnp.float32)
    h2 = jnp.where(h2 > 0, h2, 0.2 * h2)             # (tb, H2) f32

    # Layer 3 (H2 -> 1) folded into the lane-dense output rewrite:
    #   logits[0, i] = sum_k w3_row[0, k] * h2[i, k]   -> (1, tb)
    logits = jax.lax.dot_general(
        w3_ref[...], h2.astype(w_dtype),
        (((1,), (1,)), ((), ())),
        preferred_element_type=jnp.float32)
    logits = logits + b3_ref[...].astype(jnp.float32)    # (1,1) broadcast

    # Sign-stable sigmoid: exp + approx reciprocal both ride the EUP slot.
    z = jnp.exp(-jnp.abs(logits))
    inv = pl.reciprocal(1.0 + z, approx=True)
    sig = jnp.where(logits >= 0, inv, z * inv)

    out_ref[...] = sig                                   # (1, tb) lane-dense f32


# ----------------------------------------------------------------------------
# VMEM / generation helpers.
# ----------------------------------------------------------------------------
def _lane_pad(n):
    return ((n + 127) // 128) * 128


def _sub_pad(n):
    return ((n + 7) // 8) * 8


def _padded_bytes_2d(shape, itemsize):
    """Bytes a 2-D array occupies in VMEM with (8,128) tile padding."""
    r, c = shape
    return _sub_pad(r) * _lane_pad(c) * itemsize


def _tpu_vmem_config():
    """(vmem_budget_bytes, physical_vmem_bytes, num_tensorcores)."""
    kind = ""
    try:
        kind = jax.devices()[0].device_kind.lower()
    except Exception:
        pass

    phys = None
    try:
        phys = int(pltpu.get_tpu_info().vmem_capacity_bytes)
    except Exception:
        pass
    if phys is None:
        # Conservative guesses from the device kind string.
        if "v5" in kind or "v6" in kind:
            phys = 128 * _MiB
        else:
            phys = 64 * _MiB           # v7x-class / unknown: be conservative

    num_tc = 2 if "v7" in kind else 1

    if phys <= 64 * _MiB:              # v7x-class: 64 MiB per TC
        budget = 24 * _MiB
    elif "v5" in kind:                 # v5e: stay close to the 16 MiB default
        budget = 12 * _MiB
    else:                              # v6e-class: plenty of physical VMEM
        budget = 32 * _MiB
    return budget, phys, num_tc


def _per_row_vmem_bytes(D, H1, H2, compute_itemsize):
    """Conservative padded VMEM bytes per batch row inside the kernel."""
    return (
        2 * _lane_pad(D) * compute_itemsize                 # x tile, 2 buffers
        + 4 * (_lane_pad(H1) + _lane_pad(H2))                # f32 h1, h2
        + compute_itemsize * (_lane_pad(H1) + _lane_pad(H2)) # casts for MXU
        + 2 * 4                                              # f32 out row, 2 bufs
    )


def _pick_batch_tile(B_pad, per_row, fixed_bytes, vmem_budget, num_tc):
    """Largest batch tile (multiple of 128, divides B_pad) within the budget.

    On 2-TC chips (v7x) the grid is additionally forced to be even and >=4
    steps when the batch allows, so each core gets >=2 pipelined tiles.
    """
    m = B_pad // 128
    avail = max(vmem_budget - fixed_bytes, 128 * per_row)
    max_d = max(1, int(avail // (per_row * 128)))
    max_d = min(max_d, m)

    def best(require_even_grid, min_grid):
        for d in range(max_d, 0, -1):
            if m % d:
                continue
            g = m // d
            if require_even_grid and (g % 2):
                continue
            if g < min_grid:
                continue
            return d
        return None

    d = None
    if num_tc >= 2 and m >= 4:
        d = best(True, 4)
    elif num_tc >= 2 and m >= 2:
        d = best(True, 2)
    if d is None:
        d = best(False, 1)
    return d * 128


# ----------------------------------------------------------------------------
# Wrapper.
# ----------------------------------------------------------------------------
def discriminator_forward(x, params, *, batch_tile=None, compute_dtype=None):
    """Fused Discriminator MLP as a single Pallas TPU kernel.

    x: [B, D]; params: w1 [D,H1], b1 [1,H1], w2 [H1,H2], b2 [1,H2],
    w3 [H2,1], b3 [1,1] (weights pre-transposed to [in, out]).
    Returns sigmoid logits of shape [B, 1] in float32.
    """
    B, D = x.shape
    w1, b1 = params["w1"], params["b1"]
    w2, b2 = params["w2"], params["b2"]
    w3, b3 = params["w3"], params["b3"]
    H1, H2 = w1.shape[1], w2.shape[1]

    # Compute dtype: follow the weights (bf16 weights -> bf16 x stream).
    if compute_dtype is None:
        compute_dtype = w1.dtype
    compute_dtype = jnp.dtype(compute_dtype)
    cd_size = compute_dtype.itemsize

    # Cast streams in the wrapper so HBM traffic is already in compute dtype.
    x_c = x if x.dtype == compute_dtype else x.astype(compute_dtype)
    w1_c = w1.astype(compute_dtype)
    w2_c = w2.astype(compute_dtype)
    w3_row = w3.reshape(1, H2).astype(compute_dtype)     # (H2,1) -> (1,H2)
    b1_f = b1.astype(jnp.float32)
    b2_f = b2.astype(jnp.float32)
    b3_2d = b3.reshape(1, 1).astype(jnp.float32)

    # Pad the batch to a multiple of 128 (lane-dense output, no whole-batch
    # VMEM staging for ragged B); slice the result back at the end.
    B_pad = _lane_pad(B)
    if B_pad != B:
        x_c = jnp.pad(x_c, ((0, B_pad - B), (0, 0)))

    vmem_budget, vmem_phys, num_tc = _tpu_vmem_config()
    per_row = _per_row_vmem_bytes(D, H1, H2, cd_size)
    fixed_bytes = 2 * (
        _padded_bytes_2d((D, H1), cd_size) + _padded_bytes_2d((1, H1), 4)
        + _padded_bytes_2d((H1, H2), cd_size) + _padded_bytes_2d((1, H2), 4)
        + _padded_bytes_2d((1, H2), cd_size) + _padded_bytes_2d((1, 1), 4))

    if batch_tile is None:
        tb = _pick_batch_tile(B_pad, per_row, fixed_bytes, vmem_budget, num_tc)
    else:
        tb = batch_tile
    assert B_pad % tb == 0 and tb % 128 == 0, \
        "batch tile must be a multiple of 128 dividing the padded batch"

    grid = (B_pad // tb,)

    # Explicit scoped-VMEM limit: padded estimate + ~25% headroom.
    est_vmem = fixed_bytes + tb * per_row
    vmem_limit = int(min(vmem_phys - 2 * _MiB,
                         max(est_vmem * 1.25, 16 * _MiB)))

    # Weights/biases are tiny: resident full blocks, constant index map.
    def full(shape):
        return pl.BlockSpec(shape, lambda i, _s=shape: (0,) * len(_s))

    flops = 2 * B_pad * (D * H1 + H1 * H2 + H2)
    bytes_accessed = (
        B_pad * D * cd_size
        + (w1.size + w2.size + H2) * cd_size
        + (b1.size + b2.size + 1) * 4
        + B_pad * 4)
    cost = pl.CostEstimate(flops=flops, transcendentals=2 * B_pad,
                           bytes_accessed=bytes_accessed)

    out_row = pl.pallas_call(
        discriminator_kernel,
        out_shape=jax.ShapeDtypeStruct((1, B_pad), jnp.float32),
        grid_spec=pltpu.PrefetchScalarGridSpec(
            num_scalar_prefetch=0,
            grid=grid,
            in_specs=[
                pl.BlockSpec((tb, D), lambda i: (i, 0)),        # x batch tile
                full((D, H1)), full((1, H1)),
                full((H1, H2)), full((1, H2)),
                full((1, H2)), full((1, 1)),
            ],
            out_specs=pl.BlockSpec((1, tb), lambda i: (0, i)),  # lane-dense slab
        ),
        compiler_params=pltpu.CompilerParams(
            dimension_semantics=("parallel",),
            vmem_limit_bytes=vmem_limit),
        cost_estimate=cost,
    )(x_c, w1_c, b1_f, w2_c, b2_f, w3_row, b3_2d)

    return out_row.reshape(B_pad, 1)[:B]


# ----------------------------------------------------------------------------
# Parameter init + pure-JAX reference.
# ----------------------------------------------------------------------------
def init_discriminator_params(key, input_dim, dtype=jnp.float32):
    """Deterministic synthetic parameters matching the nn.Module shapes."""
    h1 = 2 * input_dim // 3
    h2 = input_dim // 3
    k1, k2, k3, k4, k5, k6 = jax.random.split(key, 6)

    def linear(kw, kb, fan_in, fan_out):
        # PyTorch default Linear init: U(-1/sqrt(fan_in), 1/sqrt(fan_in)).
        bound = 1.0 / (fan_in ** 0.5)
        w = jax.random.uniform(kw, (fan_in, fan_out), dtype, -bound, bound)
        b = jax.random.uniform(kb, (1, fan_out), dtype, -bound, bound)
        return w, b

    w1, b1 = linear(k1, k2, input_dim, h1)
    w2, b2 = linear(k3, k4, h1, h2)
    w3, b3 = linear(k5, k6, h2, 1)
    return dict(w1=w1, b1=b1, w2=w2, b2=b2, w3=w3, b3=b3)


def reference_forward(x, p):
    x = x.astype(jnp.float32)
    h1 = x @ p["w1"].astype(jnp.float32) + p["b1"].astype(jnp.float32)
    h1 = jnp.where(h1 > 0, h1, 0.2 * h1)
    h2 = h1 @ p["w2"].astype(jnp.float32) + p["b2"].astype(jnp.float32)
    h2 = jnp.where(h2 > 0, h2, 0.2 * h2)
    h3 = h2 @ p["w3"].astype(jnp.float32) + p["b3"].astype(jnp.float32)
    return jax.nn.sigmoid(h3)


if __name__ == "__main__":
    key = jax.random.PRNGKey(0)
    kx, kp = jax.random.split(key)

    # Small but tiling-exercising shapes (hidden dims: 32 and 16).
    batch, input_dim = 256, 48
    x = jax.random.normal(kx, (batch, input_dim), jnp.float32)
    params = init_discriminator_params(kp, input_dim)
    ref = reference_forward(x, params)

    # f32 path (auto-sized batch tile, f32 output).
    out = jax.block_until_ready(discriminator_forward(x, params))
    assert out.shape == (batch, 1)
    assert jnp.allclose(out, ref, atol=5e-3, rtol=0.0)

    # bf16 matmul path: bf16 weights -> bf16 x stream, f32 accumulation and
    # f32 output, so probabilities are not re-quantized.
    params_bf16 = dict(params,
                       w1=params["w1"].astype(jnp.bfloat16),
                       w2=params["w2"].astype(jnp.bfloat16),
                       w3=params["w3"].astype(jnp.bfloat16))
    out_bf16 = jax.block_until_ready(discriminator_forward(x, params_bf16))
    assert out_bf16.shape == (batch, 1)
    assert out_bf16.dtype == jnp.float32
    assert jnp.allclose(out_bf16, ref, atol=3e-2, rtol=0.0)

    # Ragged batch: padded to the next multiple of 128 and sliced back.
    x_ragged = x[:200]
    out_ragged = jax.block_until_ready(discriminator_forward(x_ragged, params))
    assert out_ragged.shape == (200, 1)
    assert jnp.allclose(out_ragged, ref[:200], atol=5e-3, rtol=0.0)

    # Tiny batch: also goes through the padding path.
    x_small = x[:8]
    out_small = jax.block_until_ready(discriminator_forward(x_small, params))
    assert out_small.shape == (8, 1)
    assert jnp.allclose(out_small, ref[:8], atol=5e-3, rtol=0.0)

    # Explicit small tile to force a multi-step grid on any chip.
    out_tiled = jax.block_until_ready(
        discriminator_forward(x, params, batch_tile=128))
    assert jnp.allclose(out_tiled, ref, atol=5e-3, rtol=0.0)

    print("KERNEL_OK")
</pallas_src>

<mosaic_0001>
module attributes {stable_mosaic.version = 11 : i64} {
  func.func @discriminator_kernel(%arg0: i32, %arg1: memref<256x48xf32, #tpu.memory_space<vmem>>, %arg2: memref<48x32xf32, #tpu.memory_space<vmem>>, %arg3: memref<1x32xf32, #tpu.memory_space<vmem>>, %arg4: memref<32x16xf32, #tpu.memory_space<vmem>>, %arg5: memref<1x16xf32, #tpu.memory_space<vmem>>, %arg6: memref<1x16xf32, #tpu.memory_space<vmem>>, %arg7: memref<1x1xf32, #tpu.memory_space<vmem>>, %arg8: memref<1x256xf32, #tpu.memory_space<vmem>>) attributes {dimension_semantics = [#tpu.dimension_semantics<parallel>], iteration_bounds = array<i64: 1>, scalar_prefetch = 0 : i64, scratch_operands = 0 : i64, tpu.core_type = #tpu.core_type<tc>, window_params = [{transform_indices = @transform_0, window_bounds = array<i64: 256, 48>}, {pipeline_mode = #tpu.pipeline_mode<synchronous>, transform_indices = @transform_1, window_bounds = array<i64: 48, 32>}, {pipeline_mode = #tpu.pipeline_mode<synchronous>, transform_indices = @transform_2, window_bounds = array<i64: 1, 32>}, {pipeline_mode = #tpu.pipeline_mode<synchronous>, transform_indices = @transform_3, window_bounds = array<i64: 32, 16>}, {pipeline_mode = #tpu.pipeline_mode<synchronous>, transform_indices = @transform_4, window_bounds = array<i64: 1, 16>}, {pipeline_mode = #tpu.pipeline_mode<synchronous>, transform_indices = @transform_5, window_bounds = array<i64: 1, 16>}, {pipeline_mode = #tpu.pipeline_mode<synchronous>, transform_indices = @transform_6, window_bounds = array<i64: 1, 1>}, {transform_indices = @transform_7, window_bounds = array<i64: 1, 256>}]} {
    %c0 = arith.constant 0 : index
    %c0_0 = arith.constant 0 : index
    %0 = vector.load %arg1[%c0, %c0_0] : memref<256x48xf32, #tpu.memory_space<vmem>>, vector<256x48xf32>
    %c0_1 = arith.constant 0 : index
    %c0_2 = arith.constant 0 : index
    %1 = vector.load %arg2[%c0_1, %c0_2] : memref<48x32xf32, #tpu.memory_space<vmem>>, vector<48x32xf32>
    %cst = arith.constant dense<0.000000e+00> : vector<256x32xf32>
    %2 = tpu.matmul %0, %1, %cst {dimension_numbers = #tpu.dot_dimension_numbers<[1], [0], [0], [1], [0, 0, 1, 1], [], []>} : vector<256x48xf32>, vector<48x32xf32>, vector<256x32xf32> -> vector<256x32xf32>
    %c0_3 = arith.constant 0 : index
    %c0_4 = arith.constant 0 : index
    %3 = vector.load %arg3[%c0_3, %c0_4] : memref<1x32xf32, #tpu.memory_space<vmem>>, vector<1x32xf32>
    %4 = vector.broadcast %3 : vector<1x32xf32> to vector<256x32xf32>
    %5 = arith.addf %2, %4 : vector<256x32xf32>
    %cst_5 = arith.constant 0.000000e+00 : f32
    %6 = vector.broadcast %cst_5 : f32 to vector<256x32xf32>
    %7 = arith.cmpf ogt, %5, %6 : vector<256x32xf32>
    %cst_6 = arith.constant 2.000000e-01 : f32
    %8 = vector.broadcast %cst_6 : f32 to vector<256x32xf32>
    %9 = arith.mulf %8, %5 : vector<256x32xf32>
    %10 = arith.select %7, %5, %9 : vector<256x32xi1>, vector<256x32xf32>
    %c0_7 = arith.constant 0 : index
    %c0_8 = arith.constant 0 : index
    %11 = vector.load %arg4[%c0_7, %c0_8] : memref<32x16xf32, #tpu.memory_space<vmem>>, vector<32x16xf32>
    %cst_9 = arith.constant dense<0.000000e+00> : vector<256x16xf32>
    %12 = tpu.matmul %10, %11, %cst_9 {dimension_numbers = #tpu.dot_dimension_numbers<[1], [0], [0], [1], [0, 0, 1, 1], [], []>} : vector<256x32xf32>, vector<32x16xf32>, vector<256x16xf32> -> vector<256x16xf32>
    %c0_10 = arith.constant 0 : index
    %c0_11 = arith.constant 0 : index
    %13 = vector.load %arg5[%c0_10, %c0_11] : memref<1x16xf32, #tpu.memory_space<vmem>>, vector<1x16xf32>
    %14 = vector.broadcast %13 : vector<1x16xf32> to vector<256x16xf32>
    %15 = arith.addf %12, %14 : vector<256x16xf32>
    %cst_12 = arith.constant 0.000000e+00 : f32
    %16 = vector.broadcast %cst_12 : f32 to vector<256x16xf32>
    %17 = arith.cmpf ogt, %15, %16 : vector<256x16xf32>
    %cst_13 = arith.constant 2.000000e-01 : f32
    %18 = vector.broadcast %cst_13 : f32 to vector<256x16xf32>
    %19 = arith.mulf %18, %15 : vector<256x16xf32>
    %20 = arith.select %17, %15, %19 : vector<256x16xi1>, vector<256x16xf32>
    %c0_14 = arith.constant 0 : index
    %c0_15 = arith.constant 0 : index
    %21 = vector.load %arg6[%c0_14, %c0_15] : memref<1x16xf32, #tpu.memory_space<vmem>>, vector<1x16xf32>
    %cst_16 = arith.constant dense<0.000000e+00> : vector<1x256xf32>
    %22 = tpu.matmul %21, %20, %cst_16 {dimension_numbers = #tpu.dot_dimension_numbers<[1], [1], [0], [0], [0, 0, 1, 0], [], []>} : vector<1x16xf32>, vector<256x16xf32>, vector<1x256xf32> -> vector<1x256xf32>
    %c0_17 = arith.constant 0 : index
    %c0_18 = arith.constant 0 : index
    %23 = vector.load %arg7[%c0_17, %c0_18] : memref<1x1xf32, #tpu.memory_space<vmem>>, vector<1x1xf32>
    %24 = vector.broadcast %23 : vector<1x1xf32> to vector<1x256xf32>
    %25 = arith.addf %22, %24 : vector<1x256xf32>
    %26 = math.absf %25 : vector<1x256xf32>
    %cst_19 = arith.constant 0.000000e+00 : f32
    %27 = vector.broadcast %cst_19 : f32 to vector<1x256xf32>
    %28 = arith.subf %27, %26 : vector<1x256xf32>
    %29 = math.exp %28 : vector<1x256xf32>
    %cst_20 = arith.constant 1.000000e+00 : f32
    %30 = vector.broadcast %cst_20 : f32 to vector<1x256xf32>
    %31 = arith.addf %30, %29 : vector<1x256xf32>
    %32 = tpu.reciprocal %31 {approx = true} : vector<1x256xf32> -> vector<1x256xf32>
    %cst_21 = arith.constant 0.000000e+00 : f32
    %33 = vector.broadcast %cst_21 : f32 to vector<1x256xf32>
    %34 = arith.cmpf oge, %25, %33 : vector<1x256xf32>
    %35 = arith.mulf %29, %32 : vector<1x256xf32>
    %36 = arith.select %34, %32, %35 : vector<1x256xi1>, vector<1x256xf32>
    %c0_22 = arith.constant 0 : index
    %c0_23 = arith.constant 0 : index
    %37 = vector.load %arg8[%c0_22, %c0_23] : memref<1x256xf32, #tpu.memory_space<vmem>>, vector<1x256xf32>
    tpu.vector_store %arg8[%c0_22, %c0_23], %36 {strides = array<i32>} : memref<1x256xf32, #tpu.memory_space<vmem>>, vector<1x256xf32>,
    return
  }
  func.func @transform_0(%arg0: i32) -> (i32, i32) {
    %c0_i32 = arith.constant 0 : i32
    %c0_i32_0 = arith.constant 0 : i32
    return %arg0, %c0_i32 : i32, i32
  }
  func.func @transform_1(%arg0: i32) -> (i32, i32) {
    %c0_i32 = arith.constant 0 : i32
    %c0_i32_0 = arith.constant 0 : i32
    %c0_i32_1 = arith.constant 0 : i32
    return %c0_i32, %c0_i32_0 : i32, i32
  }
  func.func @transform_2(%arg0: i32) -> (i32, i32) {
    %c0_i32 = arith.constant 0 : i32
    %c0_i32_0 = arith.constant 0 : i32
    %c0_i32_1 = arith.constant 0 : i32
    return %c0_i32, %c0_i32_0 : i32, i32
  }
  func.func @transform_3(%arg0: i32) -> (i32, i32) {
    %c0_i32 = arith.constant 0 : i32
    %c0_i32_0 = arith.constant 0 : i32
    %c0_i32_1 = arith.constant 0 : i32
    return %c0_i32, %c0_i32_0 : i32, i32
  }
  func.func @transform_4(%arg0: i32) -> (i32, i32) {
    %c0_i32 = arith.constant 0 : i32
    %c0_i32_0 = arith.constant 0 : i32
    %c0_i32_1 = arith.constant 0 : i32
    return %c0_i32, %c0_i32_0 : i32, i32
  }
  func.func @transform_5(%arg0: i32) -> (i32, i32) {
    %c0_i32 = arith.constant 0 : i32
    %c0_i32_0 = arith.constant 0 : i32
    %c0_i32_1 = arith.constant 0 : i32
    return %c0_i32, %c0_i32_0 : i32, i32
  }
  func.func @transform_6(%arg0: i32) -> (i32, i32) {
    %c0_i32 = arith.constant 0 : i32
    %c0_i32_0 = arith.constant 0 : i32
    %c0_i32_1 = arith.constant 0 : i32
    return %c0_i32, %c0_i32_0 : i32, i32
  }
  func.func @transform_7(%arg0: i32) -> (i32, i32) {
    %c0_i32 = arith.constant 0 : i32
    %c0_i32_0 = arith.constant 0 : i32
    return %c0_i32, %arg0 : i32, i32
  }
}

</mosaic_0001>

<bundles_post_ra>
// kernel: tpu_custom_call.1
= control target key start
LH: loop header
LB: loop body
LE: loop exit
PB: predicated region body
PF: predicated region fallthrough
CT: control target
= control target key end

     0   :  { %s1429_s0 = inlined_call_operand.vmem [shape: f32[256,48], index: 0, kind: input, shape index: {}]   ;;  %s1430_s1 = inlined_call_operand.vmem [shape: f32[48,32], index: 1, kind: input, shape index: {}]   ;;  %s1431_s2 = inlined_call_operand.vmem [shape: f32[1,32], index: 2, kind: input, shape index: {}]   ;;  %s1432_s3 = inlined_call_operand.vmem [shape: f32[32,16], index: 3, kind: input, shape index: {}]   ;;  %s1433_s4 = inlined_call_operand.vmem [shape: f32[1,16], index: 4, kind: input, shape index: {}]   ;;  %s1434_s5 = inlined_call_operand.vmem [shape: f32[1,16], index: 5, kind: input, shape index: {}]   ;;  %s1435_s6 = inlined_call_operand.<no memory space> [shape: f32[1,1], index: 6, kind: input, shape index: {}]   ;;  %s1436_s7 = inlined_call_operand.hbm [shape: f32[1,256], index: 7, kind: output, shape index: {}]  }
   0x1   :  { %v12_v0 = vstv %s1435_s6 }
   0x2   :  { %13 = vst [vmem:[#allocation2] sm:$0x1] %v12_v0 }
   0x3   :  { %v66_v1 = vld [vmem:[%s1430_s1 + $0x28] sm:$0xff]  ;;  %v65_v2 = vld [vmem:[%s1430_s1 + $0x20] sm:$0xff]  ;;  %v64_v3 = vld [vmem:[%s1430_s1 + $0x18] sm:$0xff] }
   0x4   :  { %178 = vmatpush.msra.mxu0 %v66_v1  ;;  %982 = vmatpush.msra.mxu2 %v66_v1  ;;  %v63_v4 = vld [vmem:[%s1430_s1 + $0x10] sm:$0xff] }
   0x6   :  { %179 = vmatpush.msra.mxu0 %v65_v2  ;;  %983 = vmatpush.msra.mxu2 %v65_v2 }
   0x7   :  { %14 = vsyncpa [#allocation4], 0  ;;  %v62_v5 = vld [vmem:[%s1430_s1 + $0x8] sm:$0xff]  ;;  %v61_v6 = vld [vmem:[%s1430_s1] sm:$0xff]  ;;  %vm71_vm0 = vcmask 392192   ;;  %vm385_vm2 = vcmask 261120  }
   0x8   :  { %180 = vmatpush.msra.mxu0 %v64_v3  ;;  %984 = vmatpush.msra.mxu2 %v64_v3  ;;  %v29_v7 = vld [vmem:[%s1429_s0] sm:$0xff]  ;;  %v30_v8 = vld [vmem:[%s1429_s0 + $0x8] sm:$0xff]  ;;  %v31_v9 = vld [vmem:[%s1429_s0 + $0x10] sm:$0xff] }
   0x9   :  { %v32_v10 = vld [vmem:[%s1429_s0 + $0x18] sm:$0xff]  ;;  %v33_v11 = vld [vmem:[%s1429_s0 + $0x20] sm:$0xff]  ;;  %v34_v12 = vld [vmem:[%s1429_s0 + $0x28] sm:$0xff] }
   0xa   :  { %181 = vmatpush.msra.mxu0 %v63_v4  ;;  %985 = vmatpush.msra.mxu2 %v63_v4  ;;  %v35_v13 = vld [vmem:[%s1429_s0 + $0x30] sm:$0xff]  ;;  %v36_v14 = vld [vmem:[%s1429_s0 + $0x38] sm:$0xff]  ;;  %v37_v15 = vld [vmem:[%s1429_s0 + $0x40] sm:$0xff] }
   0xb   :  { %v38_v16 = vld [vmem:[%s1429_s0 + $0x48] sm:$0xff]  ;;  %v39_v17 = vld [vmem:[%s1429_s0 + $0x50] sm:$0xff]  ;;  %v40_v18 = vld [vmem:[%s1429_s0 + $0x58] sm:$0xff] }
   0xc   :  { %182 = vmatpush.msra.mxu0 %v62_v5  ;;  %986 = vmatpush.msra.mxu2 %v62_v5  ;;  %v380_v19 = vld [vmem:[%s1432_s3 + $0x18] sm:$0xff]  ;;  %v41_v20 = vld [vmem:[%s1429_s0 + $0x60] sm:$0xff]  ;;  %v379_v21 = vld [vmem:[%s1432_s3 + $0x10] sm:$0xff] }
   0xd   :  { %494 = vmatpush.msra.mxu1 %v380_v19  ;;  %988 = vmatpush.msra.mxu3 %v380_v19  ;;  %v378_v22 = vld [vmem:[%s1432_s3 + $0x8] sm:$0xff]  ;;  %v377_v23 = vld [vmem:[%s1432_s3] sm:$0xff]  ;;  %v47_v25 = vld [vmem:[%s1429_s0 + $0x90] sm:$0xff] }
   0xe   :  { %183 = vmatpush.msra.mxu0 %v61_v6  ;;  %987 = vmatpush.msra.mxu2 %v61_v6  ;;  %v42_v24 = vld [vmem:[%s1429_s0 + $0x68] sm:$0xff]  ;;  %v43_v26 = vld [vmem:[%s1429_s0 + $0x70] sm:$0xff]  ;;  %v48_v27 = vld [vmem:[%s1429_s0 + $0x98] sm:$0xff] }
   0xf   :  { %884 = vmatmul.msk.f32.vlgmr.msra.gmra.mxu0 %vm71_vm0, %v29_v7  ;;  %495 = vmatpush.msra.mxu1 %v379_v21  ;;  %v44_v28 = vld [vmem:[%s1429_s0 + $0x78] sm:$0xff]  ;;  %v49_v29 = vld [vmem:[%s1429_s0 + $0xa0] sm:$0xff]  ;;  %v50_v34 = vld [vmem:[%s1429_s0 + $0xa8] sm:$0xff] }
  0x10   :  { %989 = vmatpush.msra.mxu3 %v379_v21  ;;  %902 = vmatmul.msk.f32.vlgmr.msra.gmra.mxu2 %vm71_vm0, %v47_v25  ;;  %v1185_v30 = vld [vmem:[%s1431_s2] ss:$0 sm:$0xff]  ;;  %v46_v38 = vld [vmem:[%s1429_s0 + $0x88] sm:$0xff]  ;;  %v51_v40 = vld [vmem:[%s1429_s0 + $0xb0] sm:$0xff]  ;;  %s875_s2 = sshll.u32 %s1436_s7, 4  ;;  %s876_s2 = int_to_ptr.hbm [resolvable:$true] %s875_s2 }
  0x11   :  { %496 = vmatpush.msra.mxu1 %v378_v22  ;;  %v45_v32 = vld [vmem:[%s1429_s0 + $0x80] sm:$0xff]  ;;  %v52_v45 = vld [vmem:[%s1429_s0 + $0xb8] sm:$0xff]  ;;  %v54_v55 = vld [vmem:[%s1429_s0 + $0xc8] sm:$0xff] }
  0x12   :  { %990 = vmatpush.msra.mxu3 %v378_v22  ;;  %v53_v50 = vld [vmem:[%s1429_s0 + $0xc0] sm:$0xff]  ;;  %v55_v60 = vld [vmem:[%s1429_s0 + $0xd0] sm:$0xff]  ;;  %v56_v1 = vld [vmem:[%s1429_s0 + $0xd8] sm:$0xff] }
  0x13   :  { %497 = vmatpush.msra.mxu1 %v377_v23  ;;  %v57_v6 = vld [vmem:[%s1429_s0 + $0xe0] sm:$0xff]  ;;  %v60_v21 = vld [vmem:[%s1429_s0 + $0xf8] sm:$0xff] }
  0x14   :  { %991 = vmatpush.msra.mxu3 %v377_v23 }
  0x17   :  { %885 = vmatmul.msk.f32.gmra.mxu0 %vm71_vm0, %v30_v8 }
  0x18   :  { %903 = vmatmul.msk.f32.gmra.mxu2 %vm71_vm0, %v48_v27 }
  0x1f   :  { %886 = vmatmul.msk.f32.gmra.mxu0 %vm71_vm0, %v31_v9 }
  0x20   :  { %904 = vmatmul.msk.f32.gmra.mxu2 %vm71_vm0, %v49_v29 }
  0x27   :  { %887 = vmatmul.msk.f32.gmra.mxu0 %vm71_vm0, %v32_v10 }
  0x28   :  { %905 = vmatmul.msk.f32.gmra.mxu2 %vm71_vm0, %v50_v34 }
  0x2f   :  { %888 = vmatmul.msk.f32.gmra.mxu0 %vm71_vm0, %v33_v11  ;;  %v58_v11 = vld [vmem:[%s1429_s0 + $0xe8] sm:$0xff] }
  0x30   :  { %906 = vmatmul.msk.f32.gmra.mxu2 %vm71_vm0, %v51_v40 }
  0x37   :  { %889 = vmatmul.msk.f32.gmra.mxu0 %vm71_vm0, %v34_v12 }
  0x38   :  { %907 = vmatmul.msk.f32.gmra.mxu2 %vm71_vm0, %v52_v45 }
  0x3f   :  { %890 = vmatmul.msk.f32.gmra.mxu0 %vm71_vm0, %v35_v13 }
  0x40   :  { %908 = vmatmul.msk.f32.gmra.mxu2 %vm71_vm0, %v53_v50 }
  0x47   :  { %891 = vmatmul.msk.f32.gmra.mxu0 %vm71_vm0, %v36_v14 }
  0x48   :  { %909 = vmatmul.msk.f32.gmra.mxu2 %vm71_vm0, %v54_v55 }
  0x4f   :  { %892 = vmatmul.msk.f32.gmra.mxu0 %vm71_vm0, %v37_v15 }
  0x50   :  { %910 = vmatmul.msk.f32.gmra.mxu2 %vm71_vm0, %v55_v60 }
  0x57   :  { %893 = vmatmul.msk.f32.gmra.mxu0 %vm71_vm0, %v38_v16  ;;  %v59_v16 = vld [vmem:[%s1429_s0 + $0xf0] sm:$0xff] }
  0x58   :  { %911 = vmatmul.msk.f32.gmra.mxu2 %vm71_vm0, %v56_v1 }
  0x5f   :  { %894 = vmatmul.msk.f32.gmra.mxu0 %vm71_vm0, %v39_v17 }
  0x60   :  { %912 = vmatmul.msk.f32.gmra.mxu2 %vm71_vm0, %v57_v6 }
  0x67   :  { %895 = vmatmul.msk.f32.gmra.mxu0 %vm71_vm0, %v40_v18 }
  0x68   :  { %913 = vmatmul.msk.f32.gmra.mxu2 %vm71_vm0, %v58_v11 }
  0x6f   :  { %896 = vmatmul.msk.f32.gmra.mxu0 %vm71_vm0, %v41_v20 }
  0x70   :  { %914 = vmatmul.msk.f32.gmra.mxu2 %vm71_vm0, %v59_v16 }
  0x77   :  { %897 = vmatmul.msk.f32.gmra.mxu0 %vm71_vm0, %v42_v24 }
  0x78   :  { %915 = vmatmul.msk.f32.gmra.mxu2 %vm71_vm0, %v60_v21 }
  0x7f   :  { %898 = vmatmul.msk.f32.gmra.mxu0 %vm71_vm0, %v43_v26 }
  0x87   :  { %899 = vmatmul.msk.f32.gmra.mxu0 %vm71_vm0, %v44_v28 }
  0x8c   :  { %v185_v31 = vpop.f32.mrf.mxu0 }
  0x8d   :  { %v186_v33 = vadd.f32 %v1185_v30, %v185_v31 }
  0x8f   :  { %v313_v35 = vmul.f32 0.2, %v186_v33  ;;  %900 = vmatmul.msk.f32.gmra.mxu0 %vm71_vm0, %v45_v32  ;;  %vm281_vm1 = vcmp.gt.f32.partialorder %v186_v33, 0.0 }
  0x91   :  { %v345_v36 = vsel %vm281_vm1, %v186_v33, %v313_v35 }
  0x92   :  { %916 = vmatmul.msk.f32.vlgmr.msra.gmra.mxu1 %vm385_vm2, %v345_v36 }
  0x94   :  { %v188_v37 = vpop.f32.mrf.mxu0 }
  0x95   :  { %v189_v39 = vadd.f32 %v1185_v30, %v188_v37 }
  0x97   :  { %v314_v41 = vmul.f32 0.2, %v189_v39  ;;  %901 = vmatmul.msk.f32.gmra.mxu0 %vm71_vm0, %v46_v38  ;;  %vm282_vm3 = vcmp.gt.f32.partialorder %v189_v39, 0.0  ;;  %v239_v38 = vpop.f32.mrf.mxu2 }
  0x99   :  { %v346_v42 = vsel %vm282_vm3, %v189_v39, %v314_v41 }
  0x9a   :  { %917 = vmatmul.msk.f32.gmra.mxu1 %vm385_vm2, %v346_v42 }
  0x9c   :  { %v191_v43 = vpop.f32.mrf.mxu0 }
  0x9d   :  { %v192_v44 = vadd.f32 %v1185_v30, %v191_v43 }
  0x9f   :  { %v315_v46 = vmul.f32 0.2, %v192_v44  ;;  %vm283_vm4 = vcmp.gt.f32.partialorder %v192_v44, 0.0 }
  0xa1   :  { %v347_v47 = vsel %vm283_vm4, %v192_v44, %v315_v46  ;;  %v242_v44 = vpop.f32.mrf.mxu2 }
  0xa2   :  { %918 = vmatmul.msk.f32.gmra.mxu1 %vm385_vm2, %v347_v47 }
  0xa4   :  { %v194_v48 = vpop.f32.mrf.mxu0 }
  0xa5   :  { %v195_v49 = vadd.f32 %v1185_v30, %v194_v48 }
  0xa7   :  { %v316_v51 = vmul.f32 0.2, %v195_v49  ;;  %vm284_vm5 = vcmp.gt.f32.partialorder %v195_v49, 0.0 }
  0xa9   :  { %v348_v52 = vsel %vm284_vm5, %v195_v49, %v316_v51  ;;  %v245_v51 = vpop.f32.mrf.mxu2 }
  0xaa   :  { %919 = vmatmul.msk.f32.gmra.mxu1 %vm385_vm2, %v348_v52 }
  0xac   :  { %v197_v53 = vpop.f32.mrf.mxu0 }
  0xad   :  { %v198_v54 = vadd.f32 %v1185_v30, %v197_v53 }
  0xaf   :  { %v317_v56 = vmul.f32 0.2, %v198_v54  ;;  %vm285_vm6 = vcmp.gt.f32.partialorder %v198_v54, 0.0 }
  0xb1   :  { %v349_v57 = vsel %vm285_vm6, %v198_v54, %v317_v56 }
  0xb2   :  { %920 = vmatmul.msk.f32.gmra.mxu1 %vm385_vm2, %v349_v57  ;;  %v240_v57 = vadd.f32 %v1185_v30, %v239_v38 }
  0xb4   :  { %v200_v58 = vpop.f32.mrf.mxu0  ;;  %v331_v60 = vmul.f32 0.2, %v240_v57  ;;  %vm299_vm5 = vcmp.gt.f32.partialorder %v240_v57, 0.0 }
  0xb5   :  { %v201_v59 = vadd.f32 %v1185_v30, %v200_v58 }
  0xb7   :  { %v318_v61 = vmul.f32 0.2, %v201_v59  ;;  %vm286_vm7 = vcmp.gt.f32.partialorder %v201_v59, 0.0 }
  0xb9   :  { %v350_v62 = vsel %vm286_vm7, %v201_v59, %v318_v61  ;;  %v248_v59 = vpop.f32.mrf.mxu2 }
  0xba   :  { %921 = vmatmul.msk.f32.gmra.mxu1 %vm385_vm2, %v350_v62  ;;  %v243_v62 = vadd.f32 %v1185_v30, %v242_v44 }
  0xbc   :  { %v203_v63 = vpop.f32.mrf.mxu0  ;;  %v332_v1 = vmul.f32 0.2, %v243_v62  ;;  %vm300_vm6 = vcmp.gt.f32.partialorder %v243_v62, 0.0 }
  0xbd   :  { %v204_v0 = vadd.f32 %v1185_v30, %v203_v63  ;;  %v363_v63 = vsel %vm299_vm5, %v240_v57, %v331_v60  ;;  %vm699_vm5 = vcmask 130048  }
  0xbf   :  { %v319_v2 = vmul.f32 0.2, %v204_v0  ;;  %vm287_vm8 = vcmp.gt.f32.partialorder %v204_v0, 0.0 }
  0xc1   :  { %v351_v3 = vsel %vm287_vm8, %v204_v0, %v319_v2  ;;  %v251_v0 = vpop.f32.mrf.mxu2 }
  0xc2   :  { %922 = vmatmul.msk.f32.gmra.mxu1 %vm385_vm2, %v351_v3  ;;  %v246_v3 = vadd.f32 %v1185_v30, %v245_v51 }
  0xc4   :  { %v206_v4 = vpop.f32.mrf.mxu0  ;;  %vm301_vm7 = vcmp.gt.f32.partialorder %v246_v3, 0.0 }
  0xc5   :  { %v207_v5 = vadd.f32 %v1185_v30, %v206_v4  ;;  %v364_v4 = vsel %vm300_vm6, %v243_v62, %v332_v1 }
  0xc7   :  { %v320_v7 = vmul.f32 0.2, %v207_v5  ;;  %vm288_vm9 = vcmp.gt.f32.partialorder %v207_v5, 0.0 }
  0xc9   :  { %v352_v8 = vsel %vm288_vm9, %v207_v5, %v320_v7  ;;  %v333_v5 = vmul.f32 0.2, %v246_v3  ;;  %v254_v6 = vpop.f32.mrf.mxu2 }
  0xca   :  { %923 = vmatmul.msk.f32.gmra.mxu1 %vm385_vm2, %v352_v8  ;;  %v249_v8 = vadd.f32 %v1185_v30, %v248_v59 }
  0xcc   :  { %v209_v9 = vpop.f32.mrf.mxu0  ;;  %vm302_vm8 = vcmp.gt.f32.partialorder %v249_v8, 0.0 }
  0xcd   :  { %v210_v10 = vadd.f32 %v1185_v30, %v209_v9  ;;  %v365_v9 = vsel %vm301_vm7, %v246_v3, %v333_v5 }
  0xcf   :  { %v321_v12 = vmul.f32 0.2, %v210_v10  ;;  %vm289_vm10 = vcmp.gt.f32.partialorder %v210_v10, 0.0 }
  0xd1   :  { %v353_v13 = vsel %vm289_vm10, %v210_v10, %v321_v12  ;;  %v334_v10 = vmul.f32 0.2, %v249_v8  ;;  %v257_v12 = vpop.f32.mrf.mxu2 }
  0xd2   :  { %924 = vmatmul.msk.f32.gmra.mxu1 %vm385_vm2, %v353_v13  ;;  %v252_v13 = vadd.f32 %v1185_v30, %v251_v0 }
  0xd4   :  { %v212_v14 = vpop.f32.mrf.mxu0  ;;  %vm303_vm9 = vcmp.gt.f32.partialorder %v252_v13, 0.0 }
  0xd5   :  { %v213_v15 = vadd.f32 %v1185_v30, %v212_v14  ;;  %v366_v14 = vsel %vm302_vm8, %v249_v8, %v334_v10 }
  0xd7   :  { %v322_v17 = vmul.f32 0.2, %v213_v15  ;;  %vm290_vm11 = vcmp.gt.f32.partialorder %v213_v15, 0.0 }
  0xd9   :  { %v354_v18 = vsel %vm290_vm11, %v213_v15, %v322_v17  ;;  %v335_v15 = vmul.f32 0.2, %v252_v13  ;;  %v255_v17 = vadd.f32 %v1185_v30, %v254_v6 }
  0xda   :  { %925 = vmatmul.msk.f32.gmra.mxu1 %vm385_vm2, %v354_v18 }
  0xdb   :  { %v367_v18 = vsel %vm303_vm9, %v252_v13, %v335_v15  ;;  %vm304_vm10 = vcmp.gt.f32.partialorder %v255_v17, 0.0 }
  0xdc   :  { %v215_v19 = vpop.f32.mrf.mxu0 }
  0xdd   :  { %v216_v20 = vadd.f32 %v1185_v30, %v215_v19  ;;  %v260_v19 = vpop.f32.mrf.mxu2 }
  0xdf   :  { %v323_v22 = vmul.f32 0.2, %v216_v20  ;;  %vm291_vm12 = vcmp.gt.f32.partialorder %v216_v20, 0.0 }
  0xe1   :  { %v355_v23 = vsel %vm291_vm12, %v216_v20, %v323_v22  ;;  %v336_v20 = vmul.f32 0.2, %v255_v17  ;;  %v258_v22 = vadd.f32 %v1185_v30, %v257_v12 }
  0xe2   :  { %926 = vmatmul.msk.f32.gmra.mxu1 %vm385_vm2, %v355_v23 }
  0xe3   :  { %v368_v23 = vsel %vm304_vm10, %v255_v17, %v336_v20  ;;  %vm305_vm11 = vcmp.gt.f32.partialorder %v258_v22, 0.0 }
  0xe4   :  { %v218_v24 = vpop.f32.mrf.mxu0 }
  0xe5   :  { %v219_v25 = vadd.f32 %v1185_v30, %v218_v24  ;;  %v263_v24 = vpop.f32.mrf.mxu2 }
  0xe7   :  { %v324_v26 = vmul.f32 0.2, %v219_v25  ;;  %vm292_vm13 = vcmp.gt.f32.partialorder %v219_v25, 0.0 }
  0xe9   :  { %v356_v27 = vsel %vm292_vm13, %v219_v25, %v324_v26  ;;  %v337_v25 = vmul.f32 0.2, %v258_v22 }
  0xea   :  { %927 = vmatmul.msk.f32.gmra.mxu1 %vm385_vm2, %v356_v27  ;;  %v261_v27 = vadd.f32 %v1185_v30, %v260_v19 }
  0xec   :  { %v221_v28 = vpop.f32.mrf.mxu0  ;;  %vm306_vm12 = vcmp.gt.f32.partialorder %v261_v27, 0.0 }
  0xed   :  { %v222_v29 = vadd.f32 %v1185_v30, %v221_v28  ;;  %v369_v28 = vsel %vm305_vm11, %v258_v22, %v337_v25 }
  0xef   :  { %v325_v31 = vmul.f32 0.2, %v222_v29  ;;  %vm293_vm14 = vcmp.gt.f32.partialorder %v222_v29, 0.0 }
  0xf1   :  { %v357_v32 = vsel %vm293_vm14, %v222_v29, %v325_v31  ;;  %v338_v29 = vmul.f32 0.2, %v261_v27  ;;  %v266_v31 = vpop.f32.mrf.mxu2 }
  0xf2   :  { %928 = vmatmul.msk.f32.gmra.mxu1 %vm385_vm2, %v357_v32  ;;  %v267_v38 = vadd.f32 %v1185_v30, %v266_v31 }
  0xf4   :  { %v224_v33 = vpop.f32.mrf.mxu0  ;;  %vm308_vm14 = vcmp.gt.f32.partialorder %v267_v38, 0.0 }
  0xf5   :  { %v225_v34 = vadd.f32 %v1185_v30, %v224_v33  ;;  %v264_v33 = vadd.f32 %v1185_v30, %v263_v24 }
  0xf7   :  { %v326_v35 = vmul.f32 0.2, %v225_v34  ;;  %vm294_vm15 = vcmp.gt.f32.partialorder %v225_v34, 0.0  ;;  %vm307_vm13 = vcmp.gt.f32.partialorder %v264_v33, 0.0 }
  0xf9   :  { %v358_v36 = vsel %vm294_vm15, %v225_v34, %v326_v35  ;;  %v370_v34 = vsel %vm306_vm12, %v261_v27, %v338_v29  ;;  %v339_v35 = vmul.f32 0.2, %v264_v33 }
  0xfa   :  { %929 = vmatmul.msk.f32.gmra.mxu1 %vm385_vm2, %v358_v36 }
  0xfc   :  { %v227_v37 = vpop.f32.mrf.mxu0 }
  0xfd   :  { %v228_v39 = vadd.f32 %v1185_v30, %v227_v37  ;;  %v269_v37 = vpop.f32.mrf.mxu2 }
  0xff   :  { %v327_v40 = vmul.f32 0.2, %v228_v39  ;;  %vm295_vm0 = vcmp.gt.f32.partialorder %v228_v39, 0.0 }
 0x101   :  { %v359_v41 = vsel %vm295_vm0, %v228_v39, %v327_v40  ;;  %v371_v39 = vsel %vm307_vm13, %v264_v33, %v339_v35  ;;  %v340_v40 = vmul.f32 0.2, %v267_v38 }
 0x102   :  { %930 = vmatmul.msk.f32.gmra.mxu1 %vm385_vm2, %v359_v41 }
 0x104   :  { %v230_v42 = vpop.f32.mrf.mxu0 }
 0x105   :  { %v231_v43 = vadd.f32 %v1185_v30, %v230_v42  ;;  %v270_v42 = vadd.f32 %v1185_v30, %v269_v37  ;;  %v272_v44 = vpop.f32.mrf.mxu2 }
 0x107   :  { %v328_v45 = vmul.f32 0.2, %v231_v43  ;;  %vm296_vm1 = vcmp.gt.f32.partialorder %v231_v43, 0.0  ;;  %vm309_vm15 = vcmp.gt.f32.partialorder %v270_v42, 0.0 }
 0x109   :  { %v360_v46 = vsel %vm296_vm1, %v231_v43, %v328_v45  ;;  %v372_v43 = vsel %vm308_vm14, %v267_v38, %v340_v40  ;;  %v341_v45 = vmul.f32 0.2, %v270_v42 }
 0x10a   :  { %931 = vmatmul.msk.f32.gmra.mxu1 %vm385_vm2, %v360_v46 }
 0x10c   :  { %v233_v47 = vpop.f32.mrf.mxu0 }
 0x10d   :  { %v234_v48 = vadd.f32 %v1185_v30, %v233_v47  ;;  %v273_v47 = vadd.f32 %v1185_v30, %v272_v44 }
 0x10f   :  { %v329_v49 = vmul.f32 0.2, %v234_v48  ;;  %v1272_v50 = vpop.f32.mrf.mxu1  ;;  %vm297_vm3 = vcmp.gt.f32.partialorder %v234_v48, 0.0  ;;  %v342_v51 = vmul.f32 0.2, %v273_v47  ;;  %vm310_vm0 = vcmp.gt.f32.partialorder %v273_v47, 0.0 }
 0x111   :  { %v361_v52 = vsel %vm297_vm3, %v234_v48, %v329_v49  ;;  %v373_v48 = vsel %vm309_vm15, %v270_v42, %v341_v45  ;;  %v275_v49 = vpop.f32.mrf.mxu2 }
 0x112   :  { %932 = vmatmul.msk.f32.gmra.mxu1 %vm385_vm2, %v361_v52 }
 0x114   :  { %v236_v53 = vpop.f32.mrf.mxu0 }
 0x115   :  { %v237_v54 = vadd.f32 %v1185_v30, %v236_v53  ;;  %v276_v53 = vadd.f32 %v1185_v30, %v275_v49 }
 0x117   :  { %v330_v55 = vmul.f32 0.2, %v237_v54  ;;  %v1276_v56 = vpop.f32.mrf.mxu1  ;;  %vm298_vm4 = vcmp.gt.f32.partialorder %v237_v54, 0.0  ;;  %vm311_vm1 = vcmp.gt.f32.partialorder %v276_v53, 0.0 }
 0x119   :  { %v362_v58 = vsel %vm298_vm4, %v237_v54, %v330_v55  ;;  %v374_v54 = vsel %vm310_vm0, %v273_v47, %v342_v51  ;;  %v343_v55 = vmul.f32 0.2, %v276_v53  ;;  %v278_v57 = vpop.f32.mrf.mxu2 }
 0x11a   :  { %933 = vmatmul.msk.f32.vlgmr.msra.gmra.mxu3 %vm385_vm2, %v362_v58  ;;  %v279_v59 = vadd.f32 %v1185_v30, %v278_v57 }
 0x11b   :  { %v375_v60 = vsel %vm311_vm1, %v276_v53, %v343_v55 }
 0x11c   :  { %v344_v62 = vmul.f32 0.2, %v279_v59  ;;  %vm312_vm3 = vcmp.gt.f32.partialorder %v279_v59, 0.0 }
 0x11f   :  { %v1280_v61 = vpop.f32.mrf.mxu1 }
 0x122   :  { %934 = vmatmul.msk.f32.gmra.mxu3 %vm385_vm2, %v363_v63  ;;  %v1325_v63 = vld [vmem:[%s1433_s4] ss:$0 sm:$0xff] }
 0x123   :  { %v506_v44 = vadd.f32 %v1325_v63, %v1280_v61  ;;  %v500_v49 = vadd.f32 %v1325_v63, %v1272_v50 }
 0x125   :  { %v629_v47 = vmul.f32 0.2, %v506_v44  ;;  %vm597_vm1 = vcmp.gt.f32.partialorder %v506_v44, 0.0 }
 0x127   :  { %v1284_v2 = vpop.f32.mrf.mxu1  ;;  %v661_v61 = vsel %vm597_vm1, %v506_v44, %v629_v47 }
 0x12a   :  { %935 = vmatmul.msk.f32.gmra.mxu3 %vm385_vm2, %v364_v4  ;;  %v376_v4 = vsel %vm312_vm3, %v279_v59, %v344_v62 }
 0x12f   :  { %v1288_v7 = vpop.f32.mrf.mxu1 }
 0x132   :  { %936 = vmatmul.msk.f32.gmra.mxu3 %vm385_vm2, %v365_v9 }
 0x137   :  { %v1292_v11 = vpop.f32.mrf.mxu1 }
 0x13a   :  { %937 = vmatmul.msk.f32.gmra.mxu3 %vm385_vm2, %v366_v14 }
 0x13f   :  { %v1296_v16 = vpop.f32.mrf.mxu1 }
 0x142   :  { %938 = vmatmul.msk.f32.gmra.mxu3 %vm385_vm2, %v367_v18 }
 0x147   :  { %v1300_v21 = vpop.f32.mrf.mxu1 }
 0x148   :  { %v521_v29 = vadd.f32 %v1325_v63, %v1300_v21 }
 0x14a   :  { %939 = vmatmul.msk.f32.gmra.mxu3 %vm385_vm2, %v368_v23  ;;  %v634_v35 = vmul.f32 0.2, %v521_v29  ;;  %vm602_vm12 = vcmp.gt.f32.partialorder %v521_v29, 0.0 }
 0x14c   :  { %v666_v21 = vsel %vm602_vm12, %v521_v29, %v634_v35 }
 0x14f   :  { %v1304_v26 = vpop.f32.mrf.mxu1 }
 0x150   :  { %v524_v25 = vadd.f32 %v1325_v63, %v1304_v26 }
 0x152   :  { %940 = vmatmul.msk.f32.gmra.mxu3 %vm385_vm2, %v369_v28  ;;  %v635_v31 = vmul.f32 0.2, %v524_v25  ;;  %vm603_vm11 = vcmp.gt.f32.partialorder %v524_v25, 0.0 }
 0x154   :  { %v667_v26 = vsel %vm603_vm11, %v524_v25, %v635_v31  ;;  %v1031_v31 = vmov 0  }
 0x155   :  { %994 = vset.pattern.permute.xlu0 %v1031_v31 }
 0x157   :  { %v1308_v32 = vpop.f32.mrf.mxu1 }
 0x158   :  { %v527_v20 = vadd.f32 %v1325_v63, %v1308_v32 }
 0x15a   :  { %941 = vmatmul.msk.f32.gmra.mxu3 %vm385_vm2, %v370_v34  ;;  %v636_v27 = vmul.f32 0.2, %v527_v20  ;;  %vm604_vm10 = vcmp.gt.f32.partialorder %v527_v20, 0.0  ;;  %v518_v34 = vadd.f32 %v1325_v63, %v1296_v16 }
 0x15c   :  { %v668_v32 = vsel %vm604_vm10, %v527_v20, %v636_v27  ;;  %v633_v37 = vmul.f32 0.2, %v518_v34  ;;  %vm601_vm13 = vcmp.gt.f32.partialorder %v518_v34, 0.0 }
 0x15e   :  { %v665_v16 = vsel %vm601_vm13, %v518_v34, %v633_v37 }
 0x15f   :  { %v529_v36 = vpop.f32.mrf.mxu1 }
 0x160   :  { %v530_v17 = vadd.f32 %v1325_v63, %v529_v36  ;;  %v515_v36 = vadd.f32 %v1325_v63, %v1292_v11 }
 0x162   :  { %942 = vmatmul.msk.f32.gmra.mxu3 %vm385_vm2, %v371_v39  ;;  %v637_v22 = vmul.f32 0.2, %v530_v17  ;;  %vm605_vm9 = vcmp.gt.f32.partialorder %v530_v17, 0.0  ;;  %v512_v39 = vadd.f32 %v1325_v63, %v1288_v7  ;;  %v632_v40 = vmul.f32 0.2, %v515_v36 }
 0x163   :  { %vm600_vm14 = vcmp.gt.f32.partialorder %v515_v36, 0.0 }
 0x164   :  { %v669_v28 = vsel %vm605_vm9, %v530_v17, %v637_v22  ;;  %v631_v42 = vmul.f32 0.2, %v512_v39  ;;  %v664_v11 = vsel %vm600_vm14, %v515_v36, %v632_v40  ;;  %vm599_vm15 = vcmp.gt.f32.partialorder %v512_v39, 0.0  ;;  %v1390_v17 = vld [vmem:[%s1434_s5] sm:$0x1]  ;;  %s1032_s5 = smov [#allocation3]  }
 0x165   :  { %s873_s12 = sshll.u32 %s1032_s5, 4  ;;  %s874_s12 = int_to_ptr.vmem [resolvable:$true] %s873_s12 }
 0x166   :  { %v663_v7 = vsel %vm599_vm15, %v512_v39, %v631_v42 }
 0x167   :  { %v532_v41 = vpop.f32.mrf.mxu1 }
 0x168   :  { %v533_v13 = vadd.f32 %v1325_v63, %v532_v41  ;;  %v509_v41 = vadd.f32 %v1325_v63, %v1284_v2 }
 0x16a   :  { %943 = vmatmul.msk.f32.gmra.mxu3 %vm385_vm2, %v372_v43  ;;  %v638_v18 = vmul.f32 0.2, %v533_v13  ;;  %vm606_vm8 = vcmp.gt.f32.partialorder %v533_v13, 0.0  ;;  %v630_v45 = vmul.f32 0.2, %v509_v41  ;;  %vm598_vm0 = vcmp.gt.f32.partialorder %v509_v41, 0.0 }
 0x16c   :  { %v670_v23 = vsel %vm606_vm8, %v533_v13, %v638_v18  ;;  %v662_v2 = vsel %vm598_vm0, %v509_v41, %v630_v45 }
 0x16f   :  { %v535_v46 = vpop.f32.mrf.mxu1 }
 0x170   :  { %v536_v9 = vadd.f32 %v1325_v63, %v535_v46  ;;  %v503_v46 = vadd.f32 %v1325_v63, %v1276_v56 }
 0x172   :  { %944 = vmatmul.msk.f32.gmra.mxu3 %vm385_vm2, %v373_v48  ;;  %v639_v14 = vmul.f32 0.2, %v536_v9  ;;  %v628_v51 = vmul.f32 0.2, %v503_v46  ;;  %vm596_vm3 = vcmp.gt.f32.partialorder %v503_v46, 0.0 }
 0x174   :  { %v660_v53 = vsel %vm596_vm3, %v503_v46, %v628_v51 }
 0x177   :  { %v538_v52 = vpop.f32.mrf.mxu1 }
 0x178   :  { %v539_v30 = vadd.f32 %v1325_v63, %v538_v52  ;;  %v627_v52 = vmul.f32 0.2, %v500_v49 }
 0x17a   :  { %945 = vmatmul.msk.f32.gmra.mxu3 %vm385_vm2, %v374_v54  ;;  %v640_v10 = vmul.f32 0.2, %v539_v30  ;;  %vm608_vm7 = vcmp.gt.f32.partialorder %v539_v30, 0.0 }
 0x17c   :  { %v672_v15 = vsel %vm608_vm7, %v539_v30, %v640_v10 }
 0x17f   :  { %v541_v58 = vpop.f32.mrf.mxu1 }
 0x180   :  { %v542_v1 = vadd.f32 %v1325_v63, %v541_v58 }
 0x182   :  { %946 = vmatmul.msk.f32.gmra.mxu3 %vm385_vm2, %v375_v60  ;;  %v641_v6 = vmul.f32 0.2, %v542_v1  ;;  %vm609_vm6 = vcmp.gt.f32.partialorder %v542_v1, 0.0 }
 0x184   :  { %v673_v12 = vsel %vm609_vm6, %v542_v1, %v641_v6 }
 0x187   :  { %v544_v0 = vpop.f32.mrf.mxu1 }
 0x188   :  { %v545_v3 = vadd.f32 %v1325_v63, %v544_v0 }
 0x18a   :  { %v642_v5 = vmul.f32 0.2, %v545_v3  ;;  %947 = vmatmul.msk.f32.gmra.mxu3 %vm385_vm2, %v376_v4  ;;  %vm610_vm4 = vcmp.gt.f32.partialorder %v545_v3, 0.0  ;;  %vm607_vm2 = vcmp.gt.f32.partialorder %v536_v9, 0.0 }
 0x18b   :  { %v671_v19 = vsel %vm607_vm2, %v536_v9, %v639_v14 }
 0x18c   :  { %v674_v8 = vsel %vm610_vm4, %v545_v3, %v642_v5  ;;  %vm595_vm4 = vcmp.gt.f32.partialorder %v500_v49, 0.0 }
 0x18d   :  { %948 = vmatpush.xpose.msk.msrb.mxu2 %vm699_vm5, %v674_v8  ;;  %v659_v56 = vsel %vm595_vm4, %v500_v49, %v627_v52 }
 0x18f   :  { %v547_v51 = vpop.f32.mrf.mxu1 }
 0x191   :  { %949 = vmatpush.xpose.msk.msrb.mxu2 %vm699_vm5, %v673_v12 }
 0x195   :  { %950 = vmatpush.xpose.msk.msrb.mxu2 %vm699_vm5, %v672_v15 }
 0x199   :  { %951 = vmatpush.xpose.msk.msrb.mxu2 %vm699_vm5, %v671_v19 }
 0x19d   :  { %v1340_v24 = vpop.f32.mrf.mxu3  ;;  %952 = vmatpush.xpose.msk.msrb.mxu2 %vm699_vm5, %v670_v23 }
 0x1a1   :  { %953 = vmatpush.xpose.msk.msrb.mxu2 %vm699_vm5, %v669_v28 }
 0x1a5   :  { %v1348_v33 = vpop.f32.mrf.mxu3  ;;  %954 = vmatpush.xpose.msk.msrb.mxu2 %vm699_vm5, %v668_v32  ;;  %v692_v32 = vld [vmem:[#allocation2] sm:$0x1] }
 0x1a6   :  { %695 = vperm.xlu0 %994, %v692_v32   ;;  %v554_v46 = vadd.f32 %v1325_v63, %v1348_v33 }
 0x1a8   :  { %vm613_vm3 = vcmp.gt.f32.partialorder %v554_v46, 0.0 }
 0x1a9   :  { %955 = vmatpush.xpose.msk.msrb.mxu2 %vm699_vm5, %v667_v26 }
 0x1ad   :  { %v1356_v38 = vpop.f32.mrf.mxu3  ;;  %956 = vmatpush.xpose.msk.msrb.mxu2 %vm699_vm5, %v666_v21 }
 0x1ae   :  { %v557_v44 = vadd.f32 %v1325_v63, %v1356_v38  ;;  %v548_v38 = vadd.f32 %v1325_v63, %v547_v51 }
 0x1b0   :  { %v646_v47 = vmul.f32 0.2, %v557_v44  ;;  %vm614_vm1 = vcmp.gt.f32.partialorder %v557_v44, 0.0  ;;  %v643_v33 = vmul.f32 0.2, %v548_v38 }
 0x1b1   :  { %957 = vmatpush.xpose.msk.msrb.mxu2 %vm699_vm5, %v665_v16 }
 0x1b2   :  { %v678_v49 = vsel %vm614_vm1, %v557_v44, %v646_v47 }
 0x1b5   :  { %v1364_v43 = vpop.f32.mrf.mxu3  ;;  %958 = vmatpush.xpose.msk.msrb.mxu2 %vm699_vm5, %v664_v11 }
 0x1b6   :  { %v560_v41 = vadd.f32 %v1325_v63, %v1364_v43  ;;  %v551_v43 = vadd.f32 %v1325_v63, %v1340_v24 }
 0x1b8   :  { %v647_v45 = vmul.f32 0.2, %v560_v41  ;;  %vm615_vm0 = vcmp.gt.f32.partialorder %v560_v41, 0.0  ;;  %vm612_vm4 = vcmp.gt.f32.partialorder %v551_v43, 0.0 }
 0x1b9   :  { %959 = vmatpush.xpose.msk.msrb.mxu2 %vm699_vm5, %v663_v7 }
 0x1bd   :  { %v1372_v48 = vpop.f32.mrf.mxu3  ;;  %960 = vmatpush.xpose.msk.msrb.mxu2 %vm699_vm5, %v662_v2  ;;  %v679_v2 = vsel %vm615_vm0, %v560_v41, %v647_v45 }
 0x1be   :  { %v563_v39 = vadd.f32 %v1325_v63, %v1372_v48  ;;  %v645_v48 = vmul.f32 0.2, %v554_v46 }
 0x1c0   :  { %v648_v42 = vmul.f32 0.2, %v563_v39  ;;  %vm616_vm15 = vcmp.gt.f32.partialorder %v563_v39, 0.0  ;;  %v677_v52 = vsel %vm613_vm3, %v554_v46, %v645_v48 }
 0x1c1   :  { %961 = vmatpush.xpose.msk.msrb.mxu2 %vm699_vm5, %v661_v61  ;;  %v644_v61 = vmul.f32 0.2, %v551_v43 }
 0x1c2   :  { %v680_v7 = vsel %vm616_vm15, %v563_v39, %v648_v42 }
 0x1c5   :  { %v565_v54 = vpop.f32.mrf.mxu3  ;;  %962 = vmatpush.xpose.msk.msrb.mxu2 %vm699_vm5, %v660_v53  ;;  %v676_v53 = vsel %vm612_vm4, %v551_v43, %v644_v61 }
 0x1c6   :  { %v566_v36 = vadd.f32 %v1325_v63, %v565_v54 }
 0x1c8   :  { %v649_v40 = vmul.f32 0.2, %v566_v36  ;;  %vm617_vm14 = vcmp.gt.f32.partialorder %v566_v36, 0.0 }
 0x1c9   :  { %963 = vmatpush.xpose.msk.msrb.mxu2 %vm699_vm5, %v659_v56 }
 0x1ca   :  { %v681_v11 = vsel %vm617_vm14, %v566_v36, %v649_v40 }
 0x1cc   :  { %964 = vmatmul.msk.f32.vlgmr.msrb.gmra.mxu2 %vm699_vm5, %v1390_v17 }
 0x1cd   :  { %v568_v55 = vpop.f32.mrf.mxu3 }
 0x1ce   :  { %v569_v34 = vadd.f32 %v1325_v63, %v568_v55 }
 0x1d0   :  { %v650_v37 = vmul.f32 0.2, %v569_v34  ;;  %vm618_vm13 = vcmp.gt.f32.partialorder %v569_v34, 0.0 }
 0x1d2   :  { %v682_v16 = vsel %vm618_vm13, %v569_v34, %v650_v37 }
 0x1d5   :  { %v571_v57 = vpop.f32.mrf.mxu3 }
 0x1d6   :  { %v572_v27 = vadd.f32 %v1325_v63, %v571_v57 }
 0x1d8   :  { %v651_v35 = vmul.f32 0.2, %v572_v27  ;;  %vm619_vm12 = vcmp.gt.f32.partialorder %v572_v27, 0.0 }
 0x1da   :  { %v683_v21 = vsel %vm619_vm12, %v572_v27, %v651_v35 }
 0x1dd   :  { %v574_v58 = vpop.f32.mrf.mxu3 }
 0x1de   :  { %v575_v22 = vadd.f32 %v1325_v63, %v574_v58 }
 0x1e0   :  { %v652_v28 = vmul.f32 0.2, %v575_v22  ;;  %vm620_vm11 = vcmp.gt.f32.partialorder %v575_v22, 0.0 }
 0x1e2   :  { %v684_v26 = vsel %vm620_vm11, %v575_v22, %v652_v28 }
 0x1e5   :  { %v577_v59 = vpop.f32.mrf.mxu3 }
 0x1e6   :  { %v578_v18 = vadd.f32 %v1325_v63, %v577_v59 }
 0x1e8   :  { %v653_v23 = vmul.f32 0.2, %v578_v18  ;;  %vm621_vm10 = vcmp.gt.f32.partialorder %v578_v18, 0.0 }
 0x1ea   :  { %v685_v29 = vsel %vm621_vm10, %v578_v18, %v653_v23 }
 0x1ed   :  { %v580_v60 = vpop.f32.mrf.mxu3 }
 0x1ee   :  { %v581_v13 = vadd.f32 %v1325_v63, %v580_v60 }
 0x1f0   :  { %v654_v19 = vmul.f32 0.2, %v581_v13  ;;  %vm622_vm9 = vcmp.gt.f32.partialorder %v581_v13, 0.0 }
 0x1f2   :  { %v686_v25 = vsel %vm622_vm9, %v581_v13, %v654_v19 }
 0x1f5   :  { %v583_v50 = vpop.f32.mrf.mxu3 }
 0x1f6   :  { %v584_v9 = vadd.f32 %v1325_v63, %v583_v50 }
 0x1f8   :  { %v655_v14 = vmul.f32 0.2, %v584_v9  ;;  %vm623_vm8 = vcmp.gt.f32.partialorder %v584_v9, 0.0 }
 0x1fa   :  { %v687_v20 = vsel %vm623_vm8, %v584_v9, %v655_v14  ;;  %v863_v9 = vlaneseq }
 0x1fc   :  { %vm865_vm8 = vcmp.lt.s32.totalorder %v863_v9, 256 }
 0x1fd   :  { %v586_v62 = vpop.f32.mrf.mxu3 }
 0x1fe   :  { %v587_v30 = vadd.f32 %v1325_v63, %v586_v62 }
 0x200   :  { %v656_v10 = vmul.f32 0.2, %v587_v30  ;;  %vm624_vm2 = vcmp.gt.f32.partialorder %v587_v30, 0.0 }
 0x202   :  { %v688_v15 = vsel %vm624_vm2, %v587_v30, %v656_v10  ;;  %vm860_vm2 = vcmask 1040384  }
 0x205   :  { %v589_v0 = vpop.f32.mrf.mxu3 }
 0x206   :  { %v590_v3 = vadd.f32 %v1325_v63, %v589_v0 }
 0x208   :  { %v657_v6 = vmul.f32 0.2, %v590_v3  ;;  %vm625_vm7 = vcmp.gt.f32.partialorder %v590_v3, 0.0 }
 0x20a   :  { %v689_v12 = vsel %vm625_vm7, %v590_v3, %v657_v6 }
 0x20d   :  { %v592_v1 = vpop.f32.mrf.mxu3 }
 0x20e   :  { %v593_v4 = vadd.f32 %v1325_v63, %v592_v1 }
 0x210   :  { %v658_v5 = vmul.f32 0.2, %v593_v4  ;;  %vm626_vm6 = vcmp.gt.f32.partialorder %v593_v4, 0.0 }
 0x212   :  { %v690_v8 = vsel %vm626_vm6, %v593_v4, %v658_v5  ;;  %vm611_vm6 = vcmp.gt.f32.partialorder %v548_v38, 0.0 }
 0x213   :  { %965 = vmatpush.xpose.msk.msrb.mxu3 %vm699_vm5, %v690_v8  ;;  %v675_v54 = vsel %vm611_vm6, %v548_v38, %v643_v33 }
 0x217   :  { %966 = vmatpush.xpose.msk.msrb.mxu3 %vm699_vm5, %v689_v12 }
 0x218   :  { %v696_v24 = vpop.permute.xlu0 %695 }
 0x219   :  { %v698_v56 = vperm.slane %v696_v24, 0 }
 0x21b   :  { %967 = vmatpush.xpose.msk.msrb.mxu3 %vm699_vm5, %v688_v15 }
 0x21f   :  { %968 = vmatpush.xpose.msk.msrb.mxu3 %vm699_vm5, %v687_v20 }
 0x223   :  { %969 = vmatpush.xpose.msk.msrb.mxu3 %vm699_vm5, %v686_v25 }
 0x227   :  { %970 = vmatpush.xpose.msk.msrb.mxu3 %vm699_vm5, %v685_v29 }
 0x22b   :  { %971 = vmatpush.xpose.msk.msrb.mxu3 %vm699_vm5, %v684_v26 }
 0x22f   :  { %972 = vmatpush.xpose.msk.msrb.mxu3 %vm699_vm5, %v683_v21 }
 0x233   :  { %973 = vmatpush.xpose.msk.msrb.mxu3 %vm699_vm5, %v682_v16 }
 0x237   :  { %974 = vmatpush.xpose.msk.msrb.mxu3 %vm699_vm5, %v681_v11 }
 0x23b   :  { %975 = vmatpush.xpose.msk.msrb.mxu3 %vm699_vm5, %v680_v7 }
 0x23f   :  { %976 = vmatpush.xpose.msk.msrb.mxu3 %vm699_vm5, %v679_v2 }
 0x243   :  { %977 = vmatpush.xpose.msk.msrb.mxu3 %vm699_vm5, %v678_v49 }
 0x247   :  { %978 = vmatpush.xpose.msk.msrb.mxu3 %vm699_vm5, %v677_v52 }
 0x24b   :  { %979 = vmatpush.xpose.msk.msrb.mxu3 %vm699_vm5, %v676_v53 }
 0x24f   :  { %980 = vmatpush.xpose.msk.msrb.mxu3 %vm699_vm5, %v675_v54  ;;  %v816_v55 = vpop.f32.mrf.mxu2 }
 0x250   :  { %v817_v63 = vadd.f32 %v816_v55, %v698_v56 }
 0x252   :  { %981 = vmatmul.msk.f32.vlgmr.msrb.gmra.mxu3 %vm699_vm5, %v1390_v17  ;;  %v839_v57 = vand.u32 2147483647, %v817_v63  ;;  %vm851_vm7 = vcmp.ge.f32.partialorder %v817_v63, 0.0 }
 0x254   :  { %v841_v58 = vsub.f32 0.0, %v839_v57 }
 0x256   :  { %v843_v59 = vmul.f32 1.442695, %v841_v58 }
 0x258   :  { %997 = vpow2.f32 %v843_v59 }
 0x25e   :  { %v998_v3 = vpop.eup %997 }
 0x25f   :  { %v847_v4 = vadd.f32 1.0, %v998_v3 }
 0x2d5   :  { %v836_v60 = vpop.f32.mrf.mxu3 }
 0x2d6   :  { %v837_v50 = vadd.f32 %v836_v60, %v698_v56 }
 0x2d8   :  { %v840_v62 = vand.u32 2147483647, %v837_v50  ;;  %vm852_vm5 = vcmp.ge.f32.partialorder %v837_v50, 0.0 }
 0x2da   :  { %v842_v0 = vsub.f32 0.0, %v840_v62 }
 0x2dc   :  { %v845_v1 = vmul.f32 1.442695, %v842_v0 }
 0x2de   :  { %999 = vpow2.f32 %v845_v1 }
 0x2df   :  { %1001 = vrcp.f32 %v847_v4 }
 0x2e4   :  { %v1000_v5 = vpop.eup %999 }
 0x2e5   :  { %v848_v30 = vadd.f32 1.0, %v1000_v5  ;;  %v1002_v6 = vpop.eup %1001 }
 0x2e6   :  { %v853_v12 = vmul.f32 %v1002_v6, %v998_v3 }
 0x2e7   :  { %1003 = vrcp.f32 %v848_v30 }
 0x2e8   :  { %v855_v15 = vsel %vm851_vm7, %v1002_v6, %v853_v12 }
 0x2ed   :  { %v1004_v8 = vpop.eup %1003 }
 0x2ee   :  { %v854_v10 = vmul.f32 %v1004_v8, %v1000_v5 }
 0x2f0   :  { %v856_v13 = vsel %vm852_vm5, %v1004_v8, %v854_v10 }
 0x2f1   :  { %v859_v14 = vrot.slane %v856_v13, 7 }
 0x2f3   :  { %v861_v17 = vsel %vm860_vm2, %v855_v15, %v859_v14 }
 0x2f4   :  { %867 = vst.msk [vmem:[#allocation3] sm:$0x3] %vm865_vm8, %v861_v17 }
 0x2f5   :  { %878 = dma.vmem_to_hbm [thread:$0]  %s874_s12, 32, %s876_s2, [#allocation4]  }
 0x2f6   :  { %1029 = dma.done.wait [#allocation4], 32  }
 0x2f7   :  { %1030 = vsyncadd [#allocation4], 4294967264 }
 0x2f8   :  { %883 = vsyncpa [#allocation4], 1 }

</bundles_post_ra>
